<compile_context>
chip_gen: v5e
topology: v5e:2x2
jax: 0.10.0
libtpu: 0.0.40
codegen_flags: <defaults>
</compile_context>

<pallas_src>
import functools

import jax
import jax.numpy as jnp
import numpy as np
from jax import lax
from jax.experimental import pallas as pl
from jax.experimental.pallas import tpu as pltpu

KH, KW = 3, 5
PAD_H, PAD_W = 1, 2
BN_EPS = 1e-5

# MyConv fixed spatial mask ("only_ellipse" branch of train.get_kernel_shape()).
_KERNEL_W1 = jnp.array(
    [[0.34, 0.86, 0.99, 0.86, 0.34],
     [0.95, 1.00, 1.00, 1.00, 0.95],
     [0.34, 0.86, 0.99, 0.86, 0.34]], dtype=jnp.float32)


def _stacked_banded_weight(w_hwio, W):
    """Fold the KW taps (and W-direction zero padding) of a (KH,KW,Cin,Cout)
    conv weight into KH banded (W*Cin, W*Cout) matrices and stack them along K
    -> (KH*W*Cin, W*Cout).  Row block kh pairs with the input rows shifted by
    (kh - PAD_H).  Precomputed once on the host."""
    kh_, kw_, cin, cout = w_hwio.shape
    w = np.asarray(w_hwio, dtype=np.float32)
    B = np.zeros((kh_, W * cin, W * cout), np.float32)
    for wo in range(W):
        for kw in range(kw_):
            wi = wo + kw - PAD_W
            if 0 <= wi < W:
                B[:, wi * cin:(wi + 1) * cin, wo * cout:(wo + 1) * cout] = w[:, kw]
    return jnp.asarray(B.reshape(kh_ * W * cin, W * cout))


def _block_kernel(x_ref, w_ref, p_ref, o_ref, *, N, C, H, W):
    """Fused BasicBlock for one invocation (one grid step), entirely in VMEM:
    conv1+bn1+relu -> conv2+bn2+residual+relu."""
    NH = N * H
    WC = W * C
    inv_cnt = 1.0 / float(N * H * W)

    x = x_ref[...]                                   # (NH, WC), lane = w*C + c

    # 0/1 row-shift matrices (both directions stacked), generated from iota and
    # applied on the MXU so no unaligned sublane slices / relayouts are needed.
    #   rows [0, NH)   : up[r]  = x[r-1], zero on image-top rows   (kh = 0 tap)
    #   rows [NH, 2NH) : dn[r'] = x[r'+1], zero on image-bottom    (kh = 2 tap)
    row = lax.broadcasted_iota(jnp.int32, (2 * NH, NH), 0)
    col = lax.broadcasted_iota(jnp.int32, (2 * NH, NH), 1)
    up_sel = (row < NH) & (col == row - 1) & ((row % H) != 0)
    r2 = row - NH
    dn_sel = (row >= NH) & (col == r2 + 1) & ((r2 % H) != H - 1)
    S = jnp.where(up_sel | dn_sel, 1.0, 0.0).astype(jnp.float32)

    def channel_sum(v):
        # v: (1, WC).  Sum all lanes sharing (lane % C) and broadcast the
        # per-channel totals back over the W groups (log-doubling circular
        # rolls; XLU slot, direction-agnostic).  Requires W = 2^k.
        s = v
        step = C
        while step < WC:
            s = s + pltpu.roll(s, step, axis=1)
            step *= 2
        return s

    def conv_bn_relu(inp, layer, residual=None):
        # Row shifts for the kh=0 / kh=2 taps: one tiny MXU matmul.
        sh = jnp.dot(S, inp, preferred_element_type=jnp.float32)   # (2*NH, WC)
        # Single K = 3*WC matmul: slabs side-by-side in lanes (aligned concat).
        lhs = jnp.concatenate([sh[0:NH, :], inp, sh[NH:2 * NH, :]], axis=1)
        acc = jnp.dot(lhs, w_ref[layer], preferred_element_type=jnp.float32)

        # BatchNorm2d (training-mode batch stats, biased variance, eps=1e-5).
        # channel == lane % C.  Both reductions issued back-to-back.
        s1 = channel_sum(jnp.sum(acc, axis=0, keepdims=True))
        s2 = channel_sum(jnp.sum(acc * acc, axis=0, keepdims=True))
        mean = s1 * inv_cnt
        var = s2 * inv_cnt - mean * mean
        gamma = p_ref[2 * layer:2 * layer + 1, :]
        beta = p_ref[2 * layer + 1:2 * layer + 2, :]
        scale = gamma * lax.rsqrt(var + BN_EPS)
        shift = beta - mean * scale
        out = acc * scale + shift                     # single FMA per element
        if residual is not None:
            out = out + residual
        return jnp.maximum(out, 0.0)                  # ReLU

    h1 = conv_bn_relu(x, 0)
    o_ref[...] = conv_bn_relu(h1, 1, residual=x).astype(o_ref.dtype)


def _fused_block(x_all, w_stacked, bn_params, *, N, C, H, W):
    G = x_all.shape[0]
    NH, WC = N * H, W * C
    kernel = functools.partial(_block_kernel, N=N, C=C, H=H, W=W)
    return pl.pallas_call(
        kernel,
        out_shape=jax.ShapeDtypeStruct((G, NH, WC), jnp.float32),
        grid=(G,),
        in_specs=[
            # Per-step activations: pipelined across the grid.
            pl.BlockSpec((None, NH, WC), lambda g: (g, 0, 0)),
            # Stacked banded weights: constant block -> DMA'd once, VMEM-resident.
            pl.BlockSpec((2, KH * WC, WC), lambda g: (0, 0, 0)),
            # BN gamma/beta packed as rows [g1, b1, g2, b2, pad...]: resident.
            pl.BlockSpec((8, WC), lambda g: (0, 0)),
        ],
        out_specs=pl.BlockSpec((None, NH, WC), lambda g: (g, 0, 0)),
        compiler_params=pltpu.CompilerParams(
            dimension_semantics=("parallel",)),       # megacore / v7x 2nd TC
    )(x_all, w_stacked, bn_params)


@functools.partial(jax.jit, static_argnames=("N", "C", "H", "W"))
def basic_block_forward(x_lane, w_stacked, bn_params, *, N, C, H, W):
    """Fused BasicBlock forward over G independent invocations.

    x_lane: (G, N*H, W*C) lane-dense activations (each of the G invocations is
    normalized with its own batch statistics, matching the module applied G
    times).  No layout transposes live in this jitted path."""
    assert W & (W - 1) == 0, "lane roll-reduce assumes W is a power of two"
    assert (N * H) % 8 == 0 and (W * C) % 128 == 0, "lane-dense packing"
    assert x_lane.shape[-2:] == (N * H, W * C)
    return _fused_block(x_lane, w_stacked, bn_params, N=N, C=C, H=H, W=W)


# ---- layout helpers (NCHW boundary only; keep the model lane-dense) ---------

def nchw_to_lane(x):
    """(..., N, C, H, W) -> (..., N*H, W*C)."""
    n, c, h, w = x.shape[-4:]
    xt = jnp.moveaxis(x, -3, -1)                      # (..., N, H, W, C)
    return xt.reshape(*x.shape[:-4], n * h, w * c)


def lane_to_nchw(y, N, C, H, W):
    yt = y.reshape(*y.shape[:-2], N, H, W, C)
    return jnp.moveaxis(yt, -1, -3)                   # (..., N, C, H, W)


# ---- pure-JAX reference (validation) ----------------------------------------

def _reference(x_nchw, w1_eff, g1, b1, w2_eff, g2, b2):
    x = jnp.transpose(x_nchw, (0, 2, 3, 1))

    def conv(inp, w):
        return lax.conv_general_dilated(
            inp, w, window_strides=(1, 1),
            padding=((PAD_H, PAD_H), (PAD_W, PAD_W)),
            dimension_numbers=('NHWC', 'HWIO', 'NHWC'))

    def bn(y, g, b):
        m = jnp.mean(y, axis=(0, 1, 2), keepdims=True)
        v = jnp.mean((y - m) ** 2, axis=(0, 1, 2), keepdims=True)
        return (y - m) * lax.rsqrt(v + BN_EPS) * g + b

    out = jnp.maximum(bn(conv(x, w1_eff), g1, b1), 0.0)
    out = bn(conv(out, w2_eff), g2, b2) + x
    out = jnp.maximum(out, 0.0)
    return jnp.transpose(out, (0, 3, 1, 2))


if __name__ == "__main__":
    # BasicBlock(inplanes=8, planes=8, stride=1, downsample=None),
    # applied to G=2 independent inputs batched on the "parallel" grid axis.
    N, C, H, W = 2, 8, 16, 16
    G = 2
    WC = W * C

    key = jax.random.PRNGKey(0)
    k_w1, k_w2, k_g1, k_b1, k_g2, k_b2, k_x = jax.random.split(key, 7)

    # MyConv raw weights in torch layout (Cout, Cin, KH, KW); effective weight =
    # raw * spatial mask, transposed to HWIO (KH, KW, Cin, Cout).
    w1_raw = 0.1 * jax.random.normal(k_w1, (C, C, KH, KW), jnp.float32)
    w2_raw = 0.1 * jax.random.normal(k_w2, (C, C, KH, KW), jnp.float32)
    w1_eff = jnp.transpose(w1_raw * _KERNEL_W1, (2, 3, 1, 0))
    w2_eff = jnp.transpose(w2_raw * _KERNEL_W1, (2, 3, 1, 0))

    # BatchNorm affine params.
    g1 = 1.0 + 0.1 * jax.random.normal(k_g1, (C,), jnp.float32)
    b1 = 0.1 * jax.random.normal(k_b1, (C,), jnp.float32)
    g2 = 1.0 + 0.1 * jax.random.normal(k_g2, (C,), jnp.float32)
    b2 = 0.1 * jax.random.normal(k_b2, (C,), jnp.float32)

    x = jax.random.normal(k_x, (G, N, C, H, W), jnp.float32)

    # One-time host-side parameter packing (kept out of the jitted path):
    # stacked banded conv weights + one merged BN gamma/beta array.
    w_stacked = jnp.stack([_stacked_banded_weight(w1_eff, W),
                           _stacked_banded_weight(w2_eff, W)], axis=0)
    bn_params = jnp.zeros((8, WC), jnp.float32)
    bn_params = bn_params.at[0].set(jnp.tile(g1, W))
    bn_params = bn_params.at[1].set(jnp.tile(b1, W))
    bn_params = bn_params.at[2].set(jnp.tile(g2, W))
    bn_params = bn_params.at[3].set(jnp.tile(b2, W))

    # NCHW boundary conversion (outside the fused hot path).
    x_lane = nchw_to_lane(x)                          # (G, N*H, W*C)

    out_lane = basic_block_forward(x_lane, w_stacked, bn_params,
                                   N=N, C=C, H=H, W=W)
    out_lane = jax.block_until_ready(out_lane)
    out = lane_to_nchw(out_lane, N, C, H, W)

    assert out.shape == (G, N, C, H, W), out.shape
    for g in range(G):
        ref = _reference(x[g], w1_eff, g1, b1, w2_eff, g2, b2)
        err = float(jnp.max(jnp.abs(out[g] - ref)))
        assert jnp.allclose(out[g], ref, rtol=1e-4, atol=1e-4), \
            f"instance {g}: max abs err = {err}"

    print("KERNEL_OK")
</pallas_src>

<mosaic_0001>
module attributes {stable_mosaic.version = 11 : i64} {
  func.func @_block_kernel(%arg0: i32, %arg1: memref<1x32x128xf32, #tpu.memory_space<vmem>>, %arg2: memref<2x384x128xf32, #tpu.memory_space<vmem>>, %arg3: memref<8x128xf32, #tpu.memory_space<vmem>>, %arg4: memref<1x32x128xf32, #tpu.memory_space<vmem>>) attributes {dimension_semantics = [#tpu.dimension_semantics<parallel>], iteration_bounds = array<i64: 2>, scalar_prefetch = 0 : i64, scratch_operands = 0 : i64, tpu.core_type = #tpu.core_type<tc>, window_params = [{transform_indices = @transform_0, window_bounds = array<i64: 1, 32, 128>}, {pipeline_mode = #tpu.pipeline_mode<synchronous>, transform_indices = @transform_1, window_bounds = array<i64: 2, 384, 128>}, {pipeline_mode = #tpu.pipeline_mode<synchronous>, transform_indices = @transform_2, window_bounds = array<i64: 8, 128>}, {transform_indices = @transform_3, window_bounds = array<i64: 1, 32, 128>}]} {
    %c0 = arith.constant 0 : index
    %c0_0 = arith.constant 0 : index
    %c0_1 = arith.constant 0 : index
    %0 = vector.load %arg1[%c0, %c0_0, %c0_1] : memref<1x32x128xf32, #tpu.memory_space<vmem>>, vector<1x32x128xf32>
    %1 = vector.shape_cast %0 : vector<1x32x128xf32> to vector<32x128xf32>
    %2 = tpu.iota {dimensions = array<i32: 0>} : vector<64x32xi32>
    %3 = tpu.iota {dimensions = array<i32: 1>} : vector<64x32xi32>
    %c32_i32 = arith.constant 32 : i32
    %4 = vector.broadcast %c32_i32 : i32 to vector<64x32xi32>
    %5 = arith.cmpi slt, %2, %4 : vector<64x32xi32>
    %c1_i32 = arith.constant 1 : i32
    %6 = vector.broadcast %c1_i32 : i32 to vector<64x32xi32>
    %7 = arith.subi %2, %6 : vector<64x32xi32>
    %8 = arith.cmpi eq, %3, %7 : vector<64x32xi32>
    %9 = arith.andi %5, %8 : vector<64x32xi1>
    %c16_i32 = arith.constant 16 : i32
    %c0_i32 = arith.constant 0 : i32
    %10 = arith.cmpi eq, %c16_i32, %c0_i32 : i32
    %c1_i32_2 = arith.constant 1 : i32
    %11 = arith.select %10, %c1_i32_2, %c16_i32 : i32
    %12 = vector.broadcast %11 : i32 to vector<64x32xi32>
    %13 = arith.remsi %2, %12 : vector<64x32xi32>
    %c0_i32_3 = arith.constant 0 : i32
    %14 = vector.broadcast %c0_i32_3 : i32 to vector<64x32xi32>
    %15 = arith.cmpi ne, %13, %14 : vector<64x32xi32>
    %c0_i32_4 = arith.constant 0 : i32
    %16 = vector.broadcast %c0_i32_4 : i32 to vector<64x32xi32>
    %17 = arith.cmpi slt, %13, %16 : vector<64x32xi32>
    %c0_i32_5 = arith.constant 0 : i32
    %18 = arith.cmpi slt, %11, %c0_i32_5 : i32
    %19 = vector.broadcast %18 : i1 to vector<64x32xi1>
    %20 = vector.broadcast %19 : vector<64x32xi1> to vector<64x32xi1>
    %21 = arith.xori %17, %20 : vector<64x32xi1>
    %22 = arith.andi %21, %15 : vector<64x32xi1>
    %23 = vector.broadcast %11 : i32 to vector<64x32xi32>
    %24 = arith.addi %13, %23 : vector<64x32xi32>
    %25 = arith.select %22, %24, %13 : vector<64x32xi1>, vector<64x32xi32>
    %c0_i32_6 = arith.constant 0 : i32
    %26 = vector.broadcast %c0_i32_6 : i32 to vector<64x32xi32>
    %27 = arith.cmpi ne, %25, %26 : vector<64x32xi32>
    %28 = arith.andi %9, %27 : vector<64x32xi1>
    %c32_i32_7 = arith.constant 32 : i32
    %29 = vector.broadcast %c32_i32_7 : i32 to vector<64x32xi32>
    %30 = arith.subi %2, %29 : vector<64x32xi32>
    %c32_i32_8 = arith.constant 32 : i32
    %31 = vector.broadcast %c32_i32_8 : i32 to vector<64x32xi32>
    %32 = arith.cmpi sge, %2, %31 : vector<64x32xi32>
    %c1_i32_9 = arith.constant 1 : i32
    %33 = vector.broadcast %c1_i32_9 : i32 to vector<64x32xi32>
    %34 = arith.addi %30, %33 : vector<64x32xi32>
    %35 = arith.cmpi eq, %3, %34 : vector<64x32xi32>
    %36 = arith.andi %32, %35 : vector<64x32xi1>
    %c16_i32_10 = arith.constant 16 : i32
    %c0_i32_11 = arith.constant 0 : i32
    %37 = arith.cmpi eq, %c16_i32_10, %c0_i32_11 : i32
    %c1_i32_12 = arith.constant 1 : i32
    %38 = arith.select %37, %c1_i32_12, %c16_i32_10 : i32
    %39 = vector.broadcast %38 : i32 to vector<64x32xi32>
    %40 = arith.remsi %30, %39 : vector<64x32xi32>
    %c0_i32_13 = arith.constant 0 : i32
    %41 = vector.broadcast %c0_i32_13 : i32 to vector<64x32xi32>
    %42 = arith.cmpi ne, %40, %41 : vector<64x32xi32>
    %c0_i32_14 = arith.constant 0 : i32
    %43 = vector.broadcast %c0_i32_14 : i32 to vector<64x32xi32>
    %44 = arith.cmpi slt, %40, %43 : vector<64x32xi32>
    %c0_i32_15 = arith.constant 0 : i32
    %45 = arith.cmpi slt, %38, %c0_i32_15 : i32
    %46 = vector.broadcast %45 : i1 to vector<64x32xi1>
    %47 = vector.broadcast %46 : vector<64x32xi1> to vector<64x32xi1>
    %48 = arith.xori %44, %47 : vector<64x32xi1>
    %49 = arith.andi %48, %42 : vector<64x32xi1>
    %50 = vector.broadcast %38 : i32 to vector<64x32xi32>
    %51 = arith.addi %40, %50 : vector<64x32xi32>
    %52 = arith.select %49, %51, %40 : vector<64x32xi1>, vector<64x32xi32>
    %c15_i32 = arith.constant 15 : i32
    %53 = vector.broadcast %c15_i32 : i32 to vector<64x32xi32>
    %54 = arith.cmpi ne, %52, %53 : vector<64x32xi32>
    %55 = arith.andi %36, %54 : vector<64x32xi1>
    %56 = arith.ori %28, %55 : vector<64x32xi1>
    %cst = arith.constant 1.000000e+00 : f32
    %cst_16 = arith.constant 0.000000e+00 : f32
    %57 = vector.broadcast %cst : f32 to vector<64x32xf32>
    %58 = vector.broadcast %cst_16 : f32 to vector<64x32xf32>
    %59 = arith.select %56, %57, %58 : vector<64x32xi1>, vector<64x32xf32>
    %cst_17 = arith.constant dense<0.000000e+00> : vector<64x128xf32>
    %60 = tpu.matmul %59, %1, %cst_17 {dimension_numbers = #tpu.dot_dimension_numbers<[1], [0], [0], [1], [0, 0, 1, 1], [], []>} : vector<64x32xf32>, vector<32x128xf32>, vector<64x128xf32> -> vector<64x128xf32>
    %61 = vector.extract_strided_slice %60 {offsets = [0, 0], sizes = [32, 128], strides = [1, 1]} : vector<64x128xf32> to vector<32x128xf32>
    %62 = vector.extract_strided_slice %60 {offsets = [32, 0], sizes = [32, 128], strides = [1, 1]} : vector<64x128xf32> to vector<32x128xf32>
    %63 = tpu.concatenate %61, %1, %62 in 1 : vector<32x128xf32>, vector<32x128xf32>, vector<32x128xf32> -> vector<32x384xf32>
    %c0_18 = arith.constant 0 : index
    %c0_19 = arith.constant 0 : index
    %c0_20 = arith.constant 0 : index
    %64 = vector.load %arg2[%c0_18, %c0_19, %c0_20] : memref<2x384x128xf32, #tpu.memory_space<vmem>>, vector<1x384x128xf32>
    %65 = vector.shape_cast %64 : vector<1x384x128xf32> to vector<384x128xf32>
    %cst_21 = arith.constant dense<0.000000e+00> : vector<32x128xf32>
    %66 = tpu.matmul %63, %65, %cst_21 {dimension_numbers = #tpu.dot_dimension_numbers<[1], [0], [0], [1], [0, 0, 1, 1], [], []>} : vector<32x384xf32>, vector<384x128xf32>, vector<32x128xf32> -> vector<32x128xf32>
    %cst_22 = arith.constant dense<0.000000e+00> : vector<128xf32>
    %67 = vector.multi_reduction <add>, %66, %cst_22 [0] : vector<32x128xf32> to vector<128xf32>
    %68 = vector.shape_cast %67 : vector<128xf32> to vector<1x128xf32>
    %c8_i32 = arith.constant 8 : i32
    %69 = tpu.dynamic_rotate %68 by %c8_i32 dim 1 : vector<1x128xf32>, i32 -> vector<1x128xf32>
    %70 = arith.addf %68, %69 : vector<1x128xf32>
    %c16_i32_23 = arith.constant 16 : i32
    %71 = tpu.dynamic_rotate %70 by %c16_i32_23 dim 1 : vector<1x128xf32>, i32 -> vector<1x128xf32>
    %72 = arith.addf %70, %71 : vector<1x128xf32>
    %c32_i32_24 = arith.constant 32 : i32
    %73 = tpu.dynamic_rotate %72 by %c32_i32_24 dim 1 : vector<1x128xf32>, i32 -> vector<1x128xf32>
    %74 = arith.addf %72, %73 : vector<1x128xf32>
    %c64_i32 = arith.constant 64 : i32
    %75 = tpu.dynamic_rotate %74 by %c64_i32 dim 1 : vector<1x128xf32>, i32 -> vector<1x128xf32>
    %76 = arith.addf %74, %75 : vector<1x128xf32>
    %77 = arith.mulf %66, %66 : vector<32x128xf32>
    %cst_25 = arith.constant dense<0.000000e+00> : vector<128xf32>
    %78 = vector.multi_reduction <add>, %77, %cst_25 [0] : vector<32x128xf32> to vector<128xf32>
    %79 = vector.shape_cast %78 : vector<128xf32> to vector<1x128xf32>
    %c8_i32_26 = arith.constant 8 : i32
    %80 = tpu.dynamic_rotate %79 by %c8_i32_26 dim 1 : vector<1x128xf32>, i32 -> vector<1x128xf32>
    %81 = arith.addf %79, %80 : vector<1x128xf32>
    %c16_i32_27 = arith.constant 16 : i32
    %82 = tpu.dynamic_rotate %81 by %c16_i32_27 dim 1 : vector<1x128xf32>, i32 -> vector<1x128xf32>
    %83 = arith.addf %81, %82 : vector<1x128xf32>
    %c32_i32_28 = arith.constant 32 : i32
    %84 = tpu.dynamic_rotate %83 by %c32_i32_28 dim 1 : vector<1x128xf32>, i32 -> vector<1x128xf32>
    %85 = arith.addf %83, %84 : vector<1x128xf32>
    %c64_i32_29 = arith.constant 64 : i32
    %86 = tpu.dynamic_rotate %85 by %c64_i32_29 dim 1 : vector<1x128xf32>, i32 -> vector<1x128xf32>
    %87 = arith.addf %85, %86 : vector<1x128xf32>
    %cst_30 = arith.constant 0.001953125 : f32
    %88 = vector.broadcast %cst_30 : f32 to vector<1x128xf32>
    %89 = arith.mulf %76, %88 : vector<1x128xf32>
    %cst_31 = arith.constant 0.001953125 : f32
    %90 = vector.broadcast %cst_31 : f32 to vector<1x128xf32>
    %91 = arith.mulf %87, %90 : vector<1x128xf32>
    %92 = arith.mulf %89, %89 : vector<1x128xf32>
    %93 = arith.subf %91, %92 : vector<1x128xf32>
    %c0_32 = arith.constant 0 : index
    %c0_33 = arith.constant 0 : index
    %94 = vector.load %arg3[%c0_32, %c0_33] : memref<8x128xf32, #tpu.memory_space<vmem>>, vector<1x128xf32>
    %c1 = arith.constant 1 : index
    %c0_34 = arith.constant 0 : index
    %95 = vector.load %arg3[%c1, %c0_34] : memref<8x128xf32, #tpu.memory_space<vmem>>, vector<1x128xf32>
    %cst_35 = arith.constant 9.99999974E-6 : f32
    %96 = vector.broadcast %cst_35 : f32 to vector<1x128xf32>
    %97 = arith.addf %93, %96 : vector<1x128xf32>
    %98 = math.rsqrt %97 : vector<1x128xf32>
    %99 = arith.mulf %94, %98 : vector<1x128xf32>
    %100 = arith.mulf %89, %99 : vector<1x128xf32>
    %101 = arith.subf %95, %100 : vector<1x128xf32>
    %102 = vector.broadcast %99 : vector<1x128xf32> to vector<32x128xf32>
    %103 = arith.mulf %66, %102 : vector<32x128xf32>
    %104 = vector.broadcast %101 : vector<1x128xf32> to vector<32x128xf32>
    %105 = arith.addf %103, %104 : vector<32x128xf32>
    %cst_36 = arith.constant 0.000000e+00 : f32
    %106 = vector.broadcast %cst_36 : f32 to vector<32x128xf32>
    %107 = arith.maximumf %105, %106 : vector<32x128xf32>
    %cst_37 = arith.constant dense<0.000000e+00> : vector<64x128xf32>
    %108 = tpu.matmul %59, %107, %cst_37 {dimension_numbers = #tpu.dot_dimension_numbers<[1], [0], [0], [1], [0, 0, 1, 1], [], []>} : vector<64x32xf32>, vector<32x128xf32>, vector<64x128xf32> -> vector<64x128xf32>
    %109 = vector.extract_strided_slice %108 {offsets = [0, 0], sizes = [32, 128], strides = [1, 1]} : vector<64x128xf32> to vector<32x128xf32>
    %110 = vector.extract_strided_slice %108 {offsets = [32, 0], sizes = [32, 128], strides = [1, 1]} : vector<64x128xf32> to vector<32x128xf32>
    %111 = tpu.concatenate %109, %107, %110 in 1 : vector<32x128xf32>, vector<32x128xf32>, vector<32x128xf32> -> vector<32x384xf32>
    %c1_38 = arith.constant 1 : index
    %c0_39 = arith.constant 0 : index
    %c0_40 = arith.constant 0 : index
    %112 = vector.load %arg2[%c1_38, %c0_39, %c0_40] : memref<2x384x128xf32, #tpu.memory_space<vmem>>, vector<1x384x128xf32>
    %113 = vector.shape_cast %112 : vector<1x384x128xf32> to vector<384x128xf32>
    %cst_41 = arith.constant dense<0.000000e+00> : vector<32x128xf32>
    %114 = tpu.matmul %111, %113, %cst_41 {dimension_numbers = #tpu.dot_dimension_numbers<[1], [0], [0], [1], [0, 0, 1, 1], [], []>} : vector<32x384xf32>, vector<384x128xf32>, vector<32x128xf32> -> vector<32x128xf32>
    %cst_42 = arith.constant dense<0.000000e+00> : vector<128xf32>
    %115 = vector.multi_reduction <add>, %114, %cst_42 [0] : vector<32x128xf32> to vector<128xf32>
    %116 = vector.shape_cast %115 : vector<128xf32> to vector<1x128xf32>
    %c8_i32_43 = arith.constant 8 : i32
    %117 = tpu.dynamic_rotate %116 by %c8_i32_43 dim 1 : vector<1x128xf32>, i32 -> vector<1x128xf32>
    %118 = arith.addf %116, %117 : vector<1x128xf32>
    %c16_i32_44 = arith.constant 16 : i32
    %119 = tpu.dynamic_rotate %118 by %c16_i32_44 dim 1 : vector<1x128xf32>, i32 -> vector<1x128xf32>
    %120 = arith.addf %118, %119 : vector<1x128xf32>
    %c32_i32_45 = arith.constant 32 : i32
    %121 = tpu.dynamic_rotate %120 by %c32_i32_45 dim 1 : vector<1x128xf32>, i32 -> vector<1x128xf32>
    %122 = arith.addf %120, %121 : vector<1x128xf32>
    %c64_i32_46 = arith.constant 64 : i32
    %123 = tpu.dynamic_rotate %122 by %c64_i32_46 dim 1 : vector<1x128xf32>, i32 -> vector<1x128xf32>
    %124 = arith.addf %122, %123 : vector<1x128xf32>
    %125 = arith.mulf %114, %114 : vector<32x128xf32>
    %cst_47 = arith.constant dense<0.000000e+00> : vector<128xf32>
    %126 = vector.multi_reduction <add>, %125, %cst_47 [0] : vector<32x128xf32> to vector<128xf32>
    %127 = vector.shape_cast %126 : vector<128xf32> to vector<1x128xf32>
    %c8_i32_48 = arith.constant 8 : i32
    %128 = tpu.dynamic_rotate %127 by %c8_i32_48 dim 1 : vector<1x128xf32>, i32 -> vector<1x128xf32>
    %129 = arith.addf %127, %128 : vector<1x128xf32>
    %c16_i32_49 = arith.constant 16 : i32
    %130 = tpu.dynamic_rotate %129 by %c16_i32_49 dim 1 : vector<1x128xf32>, i32 -> vector<1x128xf32>
    %131 = arith.addf %129, %130 : vector<1x128xf32>
    %c32_i32_50 = arith.constant 32 : i32
    %132 = tpu.dynamic_rotate %131 by %c32_i32_50 dim 1 : vector<1x128xf32>, i32 -> vector<1x128xf32>
    %133 = arith.addf %131, %132 : vector<1x128xf32>
    %c64_i32_51 = arith.constant 64 : i32
    %134 = tpu.dynamic_rotate %133 by %c64_i32_51 dim 1 : vector<1x128xf32>, i32 -> vector<1x128xf32>
    %135 = arith.addf %133, %134 : vector<1x128xf32>
    %cst_52 = arith.constant 0.001953125 : f32
    %136 = vector.broadcast %cst_52 : f32 to vector<1x128xf32>
    %137 = arith.mulf %124, %136 : vector<1x128xf32>
    %cst_53 = arith.constant 0.001953125 : f32
    %138 = vector.broadcast %cst_53 : f32 to vector<1x128xf32>
    %139 = arith.mulf %135, %138 : vector<1x128xf32>
    %140 = arith.mulf %137, %137 : vector<1x128xf32>
    %141 = arith.subf %139, %140 : vector<1x128xf32>
    %c2 = arith.constant 2 : index
    %c0_54 = arith.constant 0 : index
    %142 = vector.load %arg3[%c2, %c0_54] : memref<8x128xf32, #tpu.memory_space<vmem>>, vector<1x128xf32>
    %c3 = arith.constant 3 : index
    %c0_55 = arith.constant 0 : index
    %143 = vector.load %arg3[%c3, %c0_55] : memref<8x128xf32, #tpu.memory_space<vmem>>, vector<1x128xf32>
    %cst_56 = arith.constant 9.99999974E-6 : f32
    %144 = vector.broadcast %cst_56 : f32 to vector<1x128xf32>
    %145 = arith.addf %141, %144 : vector<1x128xf32>
    %146 = math.rsqrt %145 : vector<1x128xf32>
    %147 = arith.mulf %142, %146 : vector<1x128xf32>
    %148 = arith.mulf %137, %147 : vector<1x128xf32>
    %149 = arith.subf %143, %148 : vector<1x128xf32>
    %150 = vector.broadcast %147 : vector<1x128xf32> to vector<32x128xf32>
    %151 = arith.mulf %114, %150 : vector<32x128xf32>
    %152 = vector.broadcast %149 : vector<1x128xf32> to vector<32x128xf32>
    %153 = arith.addf %151, %152 : vector<32x128xf32>
    %154 = arith.addf %153, %1 : vector<32x128xf32>
    %cst_57 = arith.constant 0.000000e+00 : f32
    %155 = vector.broadcast %cst_57 : f32 to vector<32x128xf32>
    %156 = arith.maximumf %154, %155 : vector<32x128xf32>
    %c0_58 = arith.constant 0 : index
    %c0_59 = arith.constant 0 : index
    %c0_60 = arith.constant 0 : index
    %157 = vector.load %arg4[%c0_58, %c0_59, %c0_60] : memref<1x32x128xf32, #tpu.memory_space<vmem>>, vector<1x32x128xf32>
    %158 = vector.shape_cast %157 : vector<1x32x128xf32> to vector<32x128xf32>
    %159 = vector.shape_cast %156 : vector<32x128xf32> to vector<1x32x128xf32>
    tpu.vector_store %arg4[%c0_58, %c0_59, %c0_60], %159 {strides = array<i32>} : memref<1x32x128xf32, #tpu.memory_space<vmem>>, vector<1x32x128xf32>,
    return
  }
  func.func @transform_0(%arg0: i32) -> (i32, i32, i32) {
    %c0_i32 = arith.constant 0 : i32
    %c0_i32_0 = arith.constant 0 : i32
    %c0_i32_1 = arith.constant 0 : i32
    return %arg0, %c0_i32, %c0_i32_0 : i32, i32, i32
  }
  func.func @transform_1(%arg0: i32) -> (i32, i32, i32) {
    %c0_i32 = arith.constant 0 : i32
    %c0_i32_0 = arith.constant 0 : i32
    %c0_i32_1 = arith.constant 0 : i32
    %c0_i32_2 = arith.constant 0 : i32
    return %c0_i32, %c0_i32_0, %c0_i32_1 : i32, i32, i32
  }
  func.func @transform_2(%arg0: i32) -> (i32, i32) {
    %c0_i32 = arith.constant 0 : i32
    %c0_i32_0 = arith.constant 0 : i32
    %c0_i32_1 = arith.constant 0 : i32
    return %c0_i32, %c0_i32_0 : i32, i32
  }
  func.func @transform_3(%arg0: i32) -> (i32, i32, i32) {
    %c0_i32 = arith.constant 0 : i32
    %c0_i32_0 = arith.constant 0 : i32
    %c0_i32_1 = arith.constant 0 : i32
    return %arg0, %c0_i32, %c0_i32_0 : i32, i32, i32
  }
}

</mosaic_0001>

<bundles_post_ra>
// kernel: basic_block_forward.1
= control target key start
LH: loop header
LB: loop body
LE: loop exit
PB: predicated region body
PF: predicated region fallthrough
CT: control target
= control target key end

     0   :  { %8 = vsyncpa [#allocation3], 0  ;;  %s1825_s0 = inlined_call_operand.hbm [shape: f32[2,32,128], index: 0, kind: input, shape index: {}]   ;;  %s1826_s1 = inlined_call_operand.hbm [shape: f32[2,384,128], index: 1, kind: input, shape index: {}]   ;;  %s1827_s2 = inlined_call_operand.hbm [shape: f32[8,128], index: 2, kind: input, shape index: {}]   ;;  %s1828_s3 = inlined_call_operand.hbm [shape: f32[2,32,128], index: 3, kind: output, shape index: {}]  }
   0x1   :  { %10 = vsyncpa [#allocation3 + $0x1], 0 }
   0x2   :  { %11 = vsyncpa [#allocation6], 0 }
   0x3   :  { %12 = vsyncpa [#allocation4], 0 }
   0x4   :  { %14 = vsyncpa [#allocation4 + $0x1], 0  ;;  %s1512_s12 = smov 0   ;;  %s1514_s13 = smov 0  }
   0x5   :  { %s1516_s14 = smov 0   ;;  %s1518_s15 = smov 0  }
   0x6 LB: > { %s1533_s16 = sadd.s32 4294967295, %s1480_s15   ;;  %s1190_s17 = sadd.s32 4294967294, %s1480_s15   ;;  %s1480_s15 = sphi %s1518_s15, %s1838_s15   ;;  %s1476_s14 = sphi %s1516_s14, %s1837_s14   ;;  %s1472_s13 = sphi %s1514_s13, %s1836_s13   ;;  %s1468_s12 = sphi %s1512_s12, %s1835_s12  }
   0x7   : > { %p40_p0 = scmp.ne.s32.totalorder %s1472_s13, %s1468_s12  ;;  %p41_p1 = scmp.eq.s32.totalorder %s1533_s16, 0 }
   0x8   : > { %p106_p2 = scmp.eq.s32.totalorder %s1533_s16, 1  ;;  %p112_p3 = scmp.eq.s32.totalorder %s1190_s17, 1 }
   0x9   : > { %p1542_p4 = por %p41_p1, %p40_p0  ;;  %p1191_p5 = scmp.ge.s32.totalorder %s1480_s15, 1 }
   0xa   : > { %p1547_p6 = por %p112_p3, %p40_p0  ;;  %p119_p7 = scmp.lt.s32.totalorder %s1480_s15, 3 }
   0xb   : > { %s130_s22 = sshll.u32 %s1826_s1, 4  ;;  %s1482_s24 = smov [#allocation5]   ;;  %s131_s22 = int_to_ptr.hbm [resolvable:$true] %s130_s22 }
   0xc   : > { %p1555_p8 = pnand %p1191_p5, %p119_p7  ;;  %s132_s25 = sshll.u32 %s1482_s24, 4  ;;  %s133_s25 = int_to_ptr.vmem [resolvable:$true] %s132_s25 }
   0xd   : > { %s145_s28 = sshll.u32 %s1827_s2, 4  ;;  %s1483_s29 = smov 128   ;;  %s146_s28 = int_to_ptr.hbm [resolvable:$true] %s145_s28 }
   0xe   : > { %p1253_p9 = pneg %p1555_p8  ;;  %s1484_s30 = smov 8  }
   0xf   : > { %s1485_s4 = smov [#allocation7]   ;;  %s1571_s6 = sadd.s32 1, %s1480_s15  }
  0x10   : > { %p1254_p10 = pnand %p1253_p9, %p41_p1  ;;  %s147_s5 = sshll.u32 %s1485_s4, 4  ;;  %s148_s5 = int_to_ptr.vmem [resolvable:$true] %s147_s5 }
  0x11   : > { %s27_s7 = sadd.s32 1, %s1476_s14  ;;  %s24_s8 = ssub.s32 %s1480_s15, %s1571_s6 }
  0x12   : > { %1256 = dma.hbm_to_vmem [thread:$0]  (!%p1254_p10), %s131_s22, 12288, %s133_s25, [#allocation6], %s1483_s29, %s1483_s29, %s1484_s30  }
  0x13   : > { %1259 = dma.hbm_to_vmem [thread:$0]  (!%p1254_p10), %s146_s28, 128, %s148_s5, [#allocation6]  }
  0x14   : > { %p34_p12 = scmp.ne.s32.totalorder %s1476_s14, %s1472_s13  ;;  %p25_p13 = scmp.eq.s32.totalorder %s24_s8, 0 }
  0x15   : > { %p35_p0 = scmp.eq.s32.totalorder %s1480_s15, 0  ;;  %p1270_p5 = scmp.lt.s32.totalorder %s1480_s15, 2 }
  0x16   : > { %p1581_p3 = por %p106_p2, %p34_p12  ;;  %s158_s11 = sand.u32 1, %s1476_s14  }
  0x17   : > { %s1587_s10 = scalar_select %p25_p13, %s1476_s14, %s27_s7  }
  0x18   : > { %p36_p7 = por %p35_p0, %p34_p12  ;;  %s1195_s17 = sshll.u32 %s158_s11, 5 }
  0x19   : > { %s1239_s20 = sshll.u32 %s1480_s15, 5  ;;  %s162_s25 = scalar_lea.vmem [#allocation2], %s1195_s17 }
  0x1a   : > { %s167_s24 = scalar_lea.hbm %s1825_s0, %s1239_s20  ;;  %s170_s26 = sshll.u32 %s162_s25, 4  ;;  %s171_s26 = int_to_ptr.vmem [resolvable:$true] %s170_s26 }
  0x1b   : > { %s168_s27 = sshll.u32 %s167_s24, 4  ;;  %p1594_p2 = pnand %p1270_p5, %p36_p7  ;;  %s169_s27 = int_to_ptr.hbm [resolvable:$true] %s168_s27 }
  0x1c   : > { %s159_s4 = scalar_lea.sflag [#allocation3], %s158_s11  ;;  %s1380_s5 = sshra.s32 %s169_s27, 4  ;;  %s1381_s5 = int_to_ptr.hbm [resolvable:$true] %s1380_s5 }
  0x1d   : > { %s1382_s7 = scalar_lea.hbm %s1381_s5, 32  ;;  %p1384_p10 = pneg %p1594_p2 }
  0x1e   : > { %p1383_p9 = scmp.ne.s32.totalorder %s1381_s5, %s1382_s7  ;;  %s1387_s20 = scalar_lea.hbm %s1825_s0, 64 }
  0x1f   : > { %p1388_p0 = scmp.lt.s32.totalorder %s1381_s5, %s1825_s0  ;;  %p1389_p5 = scmp.lt.s32.totalorder %s1387_s20, %s1382_s7 }
  0x20   : > { %p1385_p12 = pnand %p1384_p10, %p1383_p9 }
  0x21   : > { %p1390_p7 = por %p1389_p5, %p1388_p0 }
  0x22   : > { %p1386_p13 = pneg %p1385_p12 }
  0x24   : > { %p1391_p11 = pnand %p1390_p7, %p1386_p13 }
  0x26   : > { %1394 = shalt.err (!%p1391_p11)
}
  0x27   : > { %1263 = dma.hbm_to_vmem [thread:$0]  (!%p1594_p2), %s169_s27, 512, %s171_s26, %s159_s4, %s1483_s29, %s1483_s29, %s1484_s30  }
  0x28   : > { %182 = sbr.rel (%p1555_p8) target bundleno = 1697 (0x6a1), region = 32  ;;  %s1614_s11 = sand.u32 (!%p1555_p8), 1, %s1472_s13  }
  0x29   : > { %s1199_s24 = sshll.u32 (!%p1555_p8), %s1614_s11, 5  ;;  %s185_s25 = scalar_lea.sflag (!%p1555_p8), [#allocation3], %s1614_s11 }
  0x2a   : > { %s188_s5 = scalar_lea.vmem (!%p1555_p8), [#allocation2], %s1199_s24 }
  0x2d   : > { %1455 = dma.done.wait (%p1542_p4), %s185_s25, 512  }
  0x2e   : > { %1457 = vsyncadd (%p1542_p4), %s185_s25, 4294966784 }
  0x2f   : > { %1459 = dma.done.wait (%p41_p1), [#allocation6], 12416  }
  0x30   : > { %1461 = vsyncadd (%p41_p1), [#allocation6], 4294954880  ;;  %v226_v0 = vlaneseq  ;;  %v1635_v5 = vld [vmem:[%s188_s5 + $0x18] sm:$0xff]  ;;  %v1637_v6 = vld [vmem:[%s188_s5 + $0x10] sm:$0xff]  ;;  %v1486_v10 = vmov 0.0   ;;  %vm536_vm3 = vcmask 261120  }
  0x31   : > { %573 = vmatpush.msra.mxu0 %v1635_v5  ;;  %v1640_v7 = vld [vmem:[%s188_s5 + $0x8] sm:$0xff]  ;;  %v1644_v9 = vld [vmem:[%s188_s5] sm:$0xff]  ;;  %v633_v24 = vld [vmem:[#allocation5 + $0xf8] sm:$0xff]  ;;  %s1487_s18 = smov 8   ;;  %s1488_s23 = smov 16  }
  0x32   : > { %v1628_v1 = vshrl.u32 %v226_v0, 7  ;;  %v1630_v2 = vand.u32 127, %v226_v0  ;;  %v632_v25 = vld [vmem:[#allocation5 + $0xf0] sm:$0xff]  ;;  %679 = vmatpush.msra.mxu2 %v633_v24  ;;  %v617_v26 = vld [vmem:[#allocation5 + $0x78] sm:$0xff]  ;;  %v631_v28 = vld [vmem:[#allocation5 + $0xe8] sm:$0xff]  ;;  %s1489_s29 = smov 32  }
  0x33   : > { %574 = vmatpush.msra.mxu0 %v1637_v6  ;;  %v616_v27 = vld [vmem:[#allocation5 + $0x70] sm:$0xff]  ;;  %650 = vmatpush.msra.mxu1 %v617_v26  ;;  %v615_v31 = vld [vmem:[#allocation5 + $0x68] sm:$0xff]  ;;  %v630_v32 = vld [vmem:[#allocation5 + $0xe0] sm:$0xff]  ;;  %s1490_s30 = smov 64   ;;  %s1240_s26 = sshll.u32 %s1533_s16, 5 }
  0x34   : > { %v1203_v3 = vadd.s32 4294967295, %v1628_v1  ;;  %v273_v4 = vand.u32 15, %v1628_v1  ;;  %v228_v8 = vadd.s32 8, %v1628_v1  ;;  %v229_v13 = vadd.s32 16, %v1628_v1  ;;  %680 = vmatpush.msra.mxu2 %v632_v25  ;;  %v614_v34 = vld [vmem:[#allocation5 + $0x60] sm:$0xff]  ;;  %v629_v36 = vld [vmem:[#allocation5 + $0xd8] sm:$0xff]  ;;  %s1094_s4 = scalar_lea.hbm %s1828_s3, %s1240_s26 }
  0x35   : > { %575 = vmatpush.msra.mxu0 %v1640_v7  ;;  %v230_v17 = vadd.s32 24, %v1628_v1  ;;  %v232_v20 = vadd.s32 40, %v1628_v1  ;;  %v400_v22 = vadd.s32 1, %v1628_v1  ;;  %651 = vmatpush.msra.mxu1 %v616_v27  ;;  %v233_v35 = vadd.s32 48, %v1628_v1  ;;  %v613_v37 = vld [vmem:[#allocation5 + $0x58] sm:$0xff]  ;;  %v628_v38 = vld [vmem:[#allocation5 + $0xd0] sm:$0xff] }
  0x36   : > { %vm253_vm0 = vcmp.eq.s32.totalorder %v1630_v2, %v1203_v3  ;;  %vm365_vm1 = vcmp.ne.s32.totalorder %v273_v4, 0  ;;  %v1204_v12 = vadd.s32 4294967295, %v228_v8  ;;  %v1205_v14 = vadd.s32 4294967295, %v229_v13  ;;  %681 = vmatpush.msra.mxu2 %v631_v28  ;;  %v612_v39 = vld [vmem:[#allocation5 + $0x50] sm:$0xff]  ;;  %v627_v41 = vld [vmem:[#allocation5 + $0xc8] sm:$0xff]  ;;  %v626_v44 = vld [vmem:[#allocation5 + $0xc0] sm:$0xff] }
  0x37   : > { %vm373_vm2 = vmand %vm253_vm0, %vm365_vm1  ;;  %576 = vmatpush.msra.mxu0 %v1644_v9  ;;  %v287_v15 = vand.u32 15, %v229_v13  ;;  %v1206_v19 = vadd.s32 4294967295, %v230_v17  ;;  %v1215_v23 = vadd.s32 4294967264, %v232_v20  ;;  %vm408_vm9 = vcmp.eq.s32.totalorder %v1630_v2, %v400_v22  ;;  %652 = vmatpush.msra.mxu1 %v615_v31  ;;  %v611_v43 = vld [vmem:[#allocation5 + $0x48] sm:$0xff]  ;;  %v610_v46 = vld [vmem:[#allocation5 + $0x40] sm:$0xff]  ;;  %s221_s7 = scalar_lea.vmem [#allocation8], %s1199_s24 }
  0x38   : > { %v1648_v11 = vsel %vm373_vm2, 1.0, %v1486_v10  ;;  %vm254_vm4 = vcmp.eq.s32.totalorder %v1630_v2, %v1204_v12  ;;  %vm255_vm5 = vcmp.eq.s32.totalorder %v1630_v2, %v1205_v14  ;;  %v1677_v33 = vsel %vm408_vm9, 1.0, %v1486_v10  ;;  %682 = vmatpush.msra.mxu2 %v630_v32  ;;  %v625_v48 = vld [vmem:[#allocation5 + $0xb8] sm:$0xff]  ;;  %v624_v51 = vld [vmem:[#allocation5 + $0xb0] sm:$0xff]  ;;  %v623_v53 = vld [vmem:[#allocation5 + $0xa8] sm:$0xff]  ;;  %s1095_s16 = sshll.u32 %s221_s7, 4  ;;  %s1096_s16 = int_to_ptr.vmem [resolvable:$true] %s1095_s16 }
  0x39   : > { %1218 = vmatmul.msk.f32.vlgmr.msra.gmra.mxu0 %vm536_vm3, %v1648_v11  ;;  %v1656_v16 = vsel %vm254_vm4, 1.0, %v1486_v10  ;;  %vm367_vm6 = vcmp.ne.s32.totalorder %v287_v15, 0  ;;  %vm256_vm8 = vcmp.eq.s32.totalorder %v1630_v2, %v1206_v19  ;;  %v401_v29 = vadd.s32 1, %v1215_v23  ;;  %653 = vmatpush.msra.mxu1 %v614_v34  ;;  %v609_v50 = vld [vmem:[#allocation5 + $0x38] sm:$0xff]  ;;  %v608_v52 = vld [vmem:[#allocation5 + $0x30] sm:$0xff]  ;;  %v607_v56 = vld [vmem:[#allocation5 + $0x28] sm:$0xff] }
  0x3a   : > { %vm375_vm7 = vmand %vm255_vm5, %vm367_vm6  ;;  %v1670_v21 = vsel %vm256_vm8, 1.0, %v1486_v10  ;;  %v452_v30 = vand.u32 15, %v1215_v23  ;;  %683 = vmatpush.msra.mxu2 %v629_v36  ;;  %v1216_v40 = vadd.s32 4294967264, %v233_v35  ;;  %v234_v42 = vadd.s32 56, %v1628_v1  ;;  %v622_v57 = vld [vmem:[#allocation5 + $0xa0] sm:$0xff]  ;;  %v621_v60 = vld [vmem:[#allocation5 + $0x98] sm:$0xff] }
  0x3b   : > { %v1663_v18 = vsel %vm375_vm7, 1.0, %v1486_v10  ;;  %vm409_vm10 = vcmp.eq.s32.totalorder %v1630_v2, %v401_v29  ;;  %654 = vmatpush.msra.mxu1 %v613_v37  ;;  %v606_v59 = vld [vmem:[#allocation5 + $0x20] sm:$0xff]  ;;  %v605_v61 = vld [vmem:[#allocation5 + $0x18] sm:$0xff]  ;;  %v620_v62 = vld [vmem:[#allocation5 + $0x90] sm:$0xff]  ;;  %s1097_s8 = sshll.u32 %s1094_s4, 4  ;;  %s1083_s17 = scalar_lea.sflag [#allocation4], %s1614_s11  ;;  %s1098_s8 = int_to_ptr.hbm [resolvable:$true] %s1097_s8 }
  0x3c   : > { %vm509_vm11 = vcmp.ne.s32.totalorder %v452_v30, 15  ;;  %684 = vmatpush.msra.mxu2 %v628_v38  ;;  %v402_v47 = vadd.s32 1, %v1216_v40  ;;  %v1217_v49 = vadd.s32 4294967264, %v234_v42  ;;  %v604_v63 = vld [vmem:[#allocation5 + $0x10] sm:$0xff]  ;;  %v619_v0 = vld [vmem:[#allocation5 + $0x88] sm:$0xff]  ;;  %v618_v3 = vld [vmem:[#allocation5 + $0x80] sm:$0xff] }
  0x3d   : > { %vm517_vm12 = vmand %vm409_vm10, %vm509_vm11  ;;  %655 = vmatpush.msra.mxu1 %v612_v39  ;;  %v603_v1 = vld [vmem:[#allocation5 + $0x8] sm:$0xff]  ;;  %v649_v8 = vld [vmem:[#allocation5 + $0x178] sm:$0xff]  ;;  %s1424_s20 = sshra.s32 %s1098_s8, 4  ;;  %s1430_s25 = scalar_lea.hbm %s1828_s3, 64  ;;  %s1425_s20 = int_to_ptr.hbm [resolvable:$true] %s1424_s20 }
  0x3e   : > { %v1685_v45 = vsel %vm517_vm12, 1.0, %v1486_v10  ;;  %685 = vmatpush.msra.mxu2 %v627_v41  ;;  %vm410_vm13 = vcmp.eq.s32.totalorder %v1630_v2, %v402_v47  ;;  %v403_v54 = vadd.s32 1, %v1217_v49  ;;  %v466_v55 = vand.u32 15, %v1217_v49  ;;  %v648_v12 = vld [vmem:[#allocation5 + $0x170] sm:$0xff]  ;;  %708 = vmatpush.msra.mxu3 %v649_v8  ;;  %v646_v13 = vld [vmem:[#allocation5 + $0x160] sm:$0xff]  ;;  %v645_v14 = vld [vmem:[#allocation5 + $0x158] sm:$0xff]  ;;  %p1431_p11 = scmp.lt.s32.totalorder %s1425_s20, %s1828_s3 }
  0x3f   : > { %656 = vmatpush.msra.mxu1 %v611_v43  ;;  %v1691_v58 = vsel %vm410_vm13, 1.0, %v1486_v10  ;;  %v644_v15 = vld [vmem:[#allocation5 + $0x150] sm:$0xff]  ;;  %v643_v17 = vld [vmem:[#allocation5 + $0x148] sm:$0xff]  ;;  %v642_v19 = vld [vmem:[#allocation5 + $0x140] sm:$0xff]  ;;  %s1426_s21 = scalar_lea.hbm %s1425_s20, 32 }
  0x40   : > { %686 = vmatpush.msra.mxu2 %v626_v44  ;;  %vm411_vm14 = vcmp.eq.s32.totalorder %v1630_v2, %v403_v54  ;;  %vm511_vm15 = vcmp.ne.s32.totalorder %v466_v55, 15  ;;  %v602_v2 = vld [vmem:[#allocation5] sm:$0xff]  ;;  %709 = vmatpush.msra.mxu3 %v648_v12  ;;  %v641_v20 = vld [vmem:[#allocation5 + $0x138] sm:$0xff]  ;;  %v640_v22 = vld [vmem:[#allocation5 + $0x130] sm:$0xff]  ;;  %p1427_p1 = scmp.ne.s32.totalorder %s1425_s20, %s1426_s21  ;;  %p1432_p2 = scmp.lt.s32.totalorder %s1430_s25, %s1426_s21 }
  0x41   : > { %1219 = vmatmul.msk.f32.gmra.mxu0 %vm536_vm3, %v1656_v16  ;;  %657 = vmatpush.msra.mxu1 %v610_v46  ;;  %vm519_vm0 = vmand %vm411_vm14, %vm511_vm15  ;;  %v639_v23 = vld [vmem:[#allocation5 + $0x128] sm:$0xff]  ;;  %v638_v24 = vld [vmem:[#allocation5 + $0x120] sm:$0xff] }
  0x42   : > { %687 = vmatpush.msra.mxu2 %v625_v48  ;;  %v1697_v4 = vsel %vm519_vm0, 1.0, %v1486_v10  ;;  %v647_v10 = vld [vmem:[#allocation5 + $0x168] sm:$0xff]  ;;  %v637_v25 = vld [vmem:[#allocation5 + $0x118] sm:$0xff]  ;;  %v636_v26 = vld [vmem:[#allocation5 + $0x110] sm:$0xff]  ;;  %p1428_p4 = pnand %p1427_p1, %p1581_p3  ;;  %p1433_p9 = por %p1432_p2, %p1431_p11 }
  0x43   : > { %658 = vmatpush.msra.mxu1 %v609_v50  ;;  %710 = vmatpush.msra.mxu3 %v647_v10  ;;  %v635_v27 = vld [vmem:[#allocation5 + $0x108] sm:$0xff]  ;;  %v634_v28 = vld [vmem:[#allocation5 + $0x100] sm:$0xff] }
  0x44   : > { %688 = vmatpush.msra.mxu2 %v624_v51  ;;  %p1429_p8 = pneg %p1428_p4 }
  0x45   : > { %659 = vmatpush.msra.mxu1 %v608_v52  ;;  %711 = vmatpush.msra.mxu3 %v646_v13 }
  0x46   : > { %689 = vmatpush.msra.mxu2 %v623_v53  ;;  %p1434_p10 = pnand %p1433_p9, %p1429_p8 }
  0x47   : > { %660 = vmatpush.msra.mxu1 %v607_v56  ;;  %712 = vmatpush.msra.mxu3 %v645_v14 }
  0x48   : > { %690 = vmatpush.msra.mxu2 %v622_v57 }
  0x49   : > { %1220 = vmatmul.msk.f32.gmra.mxu0 %vm536_vm3, %v1663_v18  ;;  %661 = vmatpush.msra.mxu1 %v606_v59 }
  0x4a   : > { %691 = vmatpush.msra.mxu2 %v621_v60  ;;  %713 = vmatpush.msra.mxu3 %v644_v15 }
  0x4b   : > { %662 = vmatpush.msra.mxu1 %v605_v61 }
  0x4c   : > { %692 = vmatpush.msra.mxu2 %v620_v62  ;;  %714 = vmatpush.msra.mxu3 %v643_v17 }
  0x4d   : > { %663 = vmatpush.msra.mxu1 %v604_v63 }
  0x4e   : > { %693 = vmatpush.msra.mxu2 %v619_v0  ;;  %715 = vmatpush.msra.mxu3 %v642_v19 }
  0x4f   : > { %664 = vmatpush.msra.mxu1 %v603_v1 }
  0x50   : > { %694 = vmatpush.msra.mxu2 %v618_v3  ;;  %716 = vmatpush.msra.mxu3 %v641_v20 }
  0x51   : > { %1221 = vmatmul.msk.f32.gmra.mxu0 %vm536_vm3, %v1670_v21  ;;  %695 = vmatmul.f32.vlgmr.msra.gmra.mxu2 %v1644_v9 }
  0x52   : > { %665 = vmatpush.msra.mxu1 %v602_v2  ;;  %717 = vmatpush.msra.mxu3 %v640_v22 }
  0x54   : > { %718 = vmatpush.msra.mxu3 %v639_v23 }
  0x56   : > { %719 = vmatpush.msra.mxu3 %v638_v24 }
  0x58   : > { %720 = vmatpush.msra.mxu3 %v637_v25 }
  0x59   : > { %1222 = vmatmul.msk.f32.gmra.mxu0 %vm536_vm3, %v1677_v33  ;;  %698 = vmatmul.f32.gmra.mxu2 %v1640_v7 }
  0x5a   : > { %721 = vmatpush.msra.mxu3 %v636_v26 }
  0x5c   : > { %722 = vmatpush.msra.mxu3 %v635_v27 }
  0x5e   : > { %723 = vmatpush.msra.mxu3 %v634_v28 }
  0x61   : > { %1223 = vmatmul.msk.f32.gmra.mxu0 %vm536_vm3, %v1685_v45  ;;  %701 = vmatmul.f32.gmra.mxu2 %v1637_v6 }
  0x69   : > { %1224 = vmatmul.msk.f32.gmra.mxu0 %vm536_vm3, %v1691_v58  ;;  %704 = vmatmul.f32.gmra.mxu2 %v1635_v5 }
  0x71   : > { %1225 = vmatmul.msk.f32.gmra.mxu0 %vm536_vm3, %v1697_v4 }
  0xb6   : > { %v578_v29 = vpop.f32.mrf.mxu0 }
  0xb7   : > { %666 = vmatmul.f32.vlgmr.msra.gmra.mxu1 %v578_v29 }
  0xbe   : > { %v581_v30 = vpop.f32.mrf.mxu0 }
  0xbf   : > { %669 = vmatmul.f32.gmra.mxu1 %v581_v30 }
  0xc6   : > { %v584_v31 = vpop.f32.mrf.mxu0 }
  0xc7   : > { %672 = vmatmul.f32.gmra.mxu1 %v584_v31 }
  0xce   : > { %v587_v32 = vpop.f32.mrf.mxu0 }
  0xcf   : > { %675 = vmatmul.f32.gmra.mxu1 %v587_v32 }
  0xd4   : > { %v696_v38 = vpop.f32.mrf.mxu2 }
  0xd6   : > { %v590_v34 = vpop.f32.mrf.mxu0 }
  0xd7   : > { %724 = vmatmul.f32.vlgmr.msra.gmra.mxu3 %v590_v34 }
  0xdc   : > { %v699_v40 = vpop.f32.mrf.mxu2 }
  0xde   : > { %v593_v35 = vpop.f32.mrf.mxu0 }
  0xdf   : > { %727 = vmatmul.f32.gmra.mxu3 %v593_v35 }
  0xe4   : > { %v702_v46 = vpop.f32.mrf.mxu2 }
  0xe6   : > { %v596_v36 = vpop.f32.mrf.mxu0 }
  0xe7   : > { %730 = vmatmul.f32.gmra.mxu3 %v596_v36 }
  0xec   : > { %v705_v55 = vpop.f32.mrf.mxu2 }
  0xee   : > { %v599_v37 = vpop.f32.mrf.mxu0 }
  0xef   : > { %733 = vmatmul.f32.gmra.mxu3 %v599_v37 }
 0x134   : > { %v667_v39 = vpop.f32.mrf.mxu1 }
 0x135   : > { %v697_v49 = vadd.f32 %v696_v38, %v667_v39 }
 0x13c   : > { %v670_v41 = vpop.f32.mrf.mxu1 }
 0x13d   : > { %v700_v47 = vadd.f32 %v699_v40, %v670_v41  ;;  %v890_v40 = vld [vmem:[#allocation5 + $0x278] sm:$0xff]  ;;  %v889_v41 = vld [vmem:[#allocation5 + $0x270] sm:$0xff] }
 0x13e   : > { %936 = vmatpush.msrb.mxu3 %v890_v40 }
 0x140   : > { %937 = vmatpush.msrb.mxu3 %v889_v41 }
 0x144   : > { %v673_v44 = vpop.f32.mrf.mxu1 }
 0x145   : > { %v703_v50 = vadd.f32 %v702_v46, %v673_v44  ;;  %v886_v44 = vld [vmem:[#allocation5 + $0x258] sm:$0xff]  ;;  %v885_v46 = vld [vmem:[#allocation5 + $0x250] sm:$0xff] }
 0x14c   : > { %v676_v54 = vpop.f32.mrf.mxu1 }
 0x14d   : > { %v706_v57 = vadd.f32 %v705_v55, %v676_v54  ;;  %v881_v54 = vld [vmem:[#allocation5 + $0x230] sm:$0xff] }
 0x15a   : > { %v725_v42 = vpop.f32.mrf.mxu3 }
 0x15b   : > { %v1707_v52 = vadd.f32 %v725_v42, %v697_v49  ;;  %v888_v42 = vld [vmem:[#allocation5 + $0x268] sm:$0xff]  ;;  %v882_v49 = vld [vmem:[#allocation5 + $0x238] sm:$0xff] }
 0x15c   : > { %938 = vmatpush.msrb.mxu3 %v888_v42 }
 0x15d   : > { %v758_v59 = vmul.f32 %v1707_v52, %v1707_v52 }
 0x162   : > { %v728_v43 = vpop.f32.mrf.mxu3 }
 0x163   : > { %v1705_v51 = vadd.f32 %v728_v43, %v700_v47  ;;  %v887_v43 = vld [vmem:[#allocation5 + $0x260] sm:$0xff]  ;;  %v884_v47 = vld [vmem:[#allocation5 + $0x248] sm:$0xff] }
 0x164   : > { %939 = vmatpush.msrb.mxu3 %v887_v43  ;;  %v906_v43 = vld [vmem:[#allocation5 + $0x2f8] sm:$0xff] }
 0x165   : > { %v759_v56 = vmul.f32 %v1705_v51, %v1705_v51  ;;  %v737_v60 = vadd.f32 %v1705_v51, %v1707_v52  ;;  %965 = vmatpush.msrb.mxu0 %v906_v43 }
 0x166   : > { %940 = vmatpush.msrb.mxu3 %v886_v44  ;;  %v870_v44 = vld [vmem:[#allocation5 + $0x1d8] sm:$0xff] }
 0x167   : > { %v762_v63 = vadd.f32 %v759_v56, %v758_v59  ;;  %v880_v56 = vld [vmem:[#allocation5 + $0x228] sm:$0xff]  ;;  %v878_v59 = vld [vmem:[#allocation5 + $0x218] sm:$0xff] }
 0x168   : > { %941 = vmatpush.msrb.mxu3 %v885_v46  ;;  %v866_v46 = vld [vmem:[#allocation5 + $0x1b8] sm:$0xff] }
 0x16a   : > { %v731_v48 = vpop.f32.mrf.mxu3  ;;  %942 = vmatpush.msrb.mxu3 %v884_v47  ;;  %v865_v47 = vld [vmem:[#allocation5 + $0x1b0] sm:$0xff] }
 0x16b   : > { %v1709_v53 = vadd.f32 %v731_v48, %v703_v50  ;;  %v883_v48 = vld [vmem:[#allocation5 + $0x240] sm:$0xff] }
 0x16c   : > { %943 = vmatpush.msrb.mxu3 %v883_v48  ;;  %v864_v48 = vld [vmem:[#allocation5 + $0x1a8] sm:$0xff] }
 0x16d   : > { %v760_v61 = vmul.f32 %v1709_v53, %v1709_v53  ;;  %v738_v0 = vadd.f32 %v737_v60, %v1709_v53 }
 0x16e   : > { %944 = vmatpush.msrb.mxu3 %v882_v49  ;;  %v863_v49 = vld [vmem:[#allocation5 + $0x1a0] sm:$0xff] }
 0x16f   : > { %v763_v3 = vadd.f32 %v762_v63, %v760_v61  ;;  %v877_v61 = vld [vmem:[#allocation5 + $0x210] sm:$0xff] }
 0x170   : > { %945 = vmatpush.msrb.mxu3 %v881_v54  ;;  %v860_v54 = vld [vmem:[#allocation5 + $0x188] sm:$0xff] }
 0x172   : > { %v734_v62 = vpop.f32.mrf.mxu3  ;;  %946 = vmatpush.msrb.mxu3 %v880_v56  ;;  %v903_v56 = vld [vmem:[#allocation5 + $0x2e0] sm:$0xff] }
 0x173   : > { %v1720_v1 = vadd.f32 %v734_v62, %v706_v57  ;;  %v879_v57 = vld [vmem:[#allocation5 + $0x220] sm:$0xff] }
 0x174   : > { %947 = vmatpush.msrb.mxu3 %v879_v57  ;;  %v902_v57 = vld [vmem:[#allocation5 + $0x2d8] sm:$0xff] }
 0x175   : > { %v739_v2 = vadd.f32 %v738_v0, %v1720_v1  ;;  %v761_v8 = vmul.f32 %v1720_v1, %v1720_v1  ;;  %v876_v0 = vld [vmem:[#allocation5 + $0x208] sm:$0xff] }
 0x176   : > { %948 = vmatpush.msrb.mxu3 %v878_v59  ;;  %v901_v59 = vld [vmem:[#allocation5 + $0x2d0] sm:$0xff] }
 0x177   : > { %v740_v12 = vrot.slane %v739_v2, 4  ;;  %v764_v10 = vadd.f32 %v763_v3, %v761_v8  ;;  %v875_v8 = vld [vmem:[#allocation5 + $0x200] sm:$0xff] }
 0x178   : > { %949 = vmatpush.msrb.mxu3 %v877_v61  ;;  %v898_v61 = vld [vmem:[#allocation5 + $0x2b8] sm:$0xff] }
 0x179   : > { %v765_v13 = vrot.slane %v764_v10, 4  ;;  %v741_v14 = vadd.f32 %v740_v12, %v739_v2 }
 0x17a   : > { %950 = vmatpush.msrb.mxu3 %v876_v0  ;;  %v894_v0 = vld [vmem:[#allocation5 + $0x298] sm:$0xff] }
 0x17b   : > { %v742_v15 = vrot.slane %v741_v14, 2  ;;  %v766_v17 = vadd.f32 %v765_v13, %v764_v10 }
 0x17c   : > { %951 = vmatpush.msrb.mxu3 %v875_v8 }
 0x17d   : > { %v743_v19 = vadd.f32 %v742_v15, %v741_v14  ;;  %v767_v20 = vrot.slane %v766_v17, 2 }
 0x17f   : > { %v744_v22 = vrot.slane %v743_v19, 1  ;;  %v768_v24 = vadd.f32 %v767_v20, %v766_v17  ;;  %v787_v20 = vld [vmem:[#allocation7] sm:$0x1] }
 0x181   : > { %v745_v23 = vadd.f32 %v744_v22, %v743_v19  ;;  %v769_v25 = vrot.slane %v768_v24, 1 }
 0x183   : > { %746 = vrot.lane.b32.xlu0 %v745_v23, %s1487_s18  ;;  %v770_v26 = vadd.f32 %v769_v25, %v768_v24  ;;  %v788_v25 = vld [vmem:[#allocation7 + $0x1] sm:$0x1] }
 0x18b   : > { %771 = vrot.lane.b32.xlu0 %v770_v26, %s1487_s18 }
 0x1f5   : > { %v747_v27 = vpop.permute.xlu0 %746 }
 0x1f6   : > { %v748_v28 = vadd.f32 %v747_v27, %v745_v23 }
 0x1f8   : > { %749 = vrot.lane.b32.xlu1 %v748_v28, %s1488_s23 }
 0x1fd   : > { %v772_v29 = vpop.permute.xlu0 %771 }
 0x1fe   : > { %v773_v30 = vadd.f32 %v772_v29, %v770_v26 }
 0x200   : > { %774 = vrot.lane.b32.xlu1 %v773_v30, %s1488_s23 }
 0x26a   : > { %v750_v31 = vpop.permute.xlu1 %749 }
 0x26b   : > { %v751_v32 = vadd.f32 %v750_v31, %v748_v28 }
 0x26d   : > { %752 = vrot.lane.b32.xlu2 %v751_v32, %s1489_s29 }
 0x272   : > { %v775_v34 = vpop.permute.xlu1 %774 }
 0x273   : > { %v776_v35 = vadd.f32 %v775_v34, %v773_v30 }
 0x275   : > { %777 = vrot.lane.b32.xlu2 %v776_v35, %s1489_s29 }
 0x2c7   : > { %v753_v36 = vpop.permute.xlu2 %752 }
 0x2c8   : > { %v754_v37 = vadd.f32 %v753_v36, %v751_v32 }
 0x2ca   : > { %755 = vrot.lane.b32.xlu0 %v754_v37, %s1490_s30 }
 0x2cf   : > { %v778_v38 = vpop.permute.xlu2 %777 }
 0x2d0   : > { %v779_v39 = vadd.f32 %v778_v38, %v776_v35 }
 0x2d2   : > { %780 = vrot.lane.b32.xlu1 %v779_v39, %s1490_s30 }
 0x33c   : > { %v756_v50 = vpop.permute.xlu0 %755 }
 0x33d   : > { %v757_v55 = vadd.f32 %v756_v50, %v754_v37  ;;  %v862_v50 = vld [vmem:[#allocation5 + $0x198] sm:$0xff] }
 0x33f   : > { %v783_v60 = vmul.f32 0.001953125, %v757_v55  ;;  %v904_v55 = vld [vmem:[#allocation5 + $0x2e8] sm:$0xff] }
 0x341   : > { %v785_v3 = vmul.f32 %v783_v60, %v783_v60 }
 0x344   : > { %v781_v62 = vpop.permute.xlu1 %780 }
 0x345   : > { %v782_v63 = vadd.f32 %v781_v62, %v779_v39  ;;  %v897_v62 = vld [vmem:[#allocation5 + $0x2b0] sm:$0xff] }
 0x347   : > { %v784_v2 = vmul.f32 0.001953125, %v782_v63  ;;  %v896_v63 = vld [vmem:[#allocation5 + $0x2a8] sm:$0xff] }
 0x349   : > { %v786_v12 = vsub.f32 %v784_v2, %v785_v3  ;;  %v893_v3 = vld [vmem:[#allocation5 + $0x290] sm:$0xff]  ;;  %v892_v2 = vld [vmem:[#allocation5 + $0x288] sm:$0xff] }
 0x34b   : > { %v789_v10 = vadd.f32 1e-05, %v786_v12  ;;  %v891_v12 = vld [vmem:[#allocation5 + $0x280] sm:$0xff] }
 0x34d   : > { %1316 = vrsqrt.f32 %v789_v10  ;;  %vm796_vm2 = vweird.f32 %v789_v10 }
 0x353   : > { %v1317_v13 = vpop.eup %1316 }
 0x354   : > { %v791_v14 = vmul.f32 %v1317_v13, %v789_v10  ;;  %vm797_vm1 = vweird.f32 %v1317_v13 }
 0x355   : > { %vm798_vm4 = vmor %vm796_vm2, %vm797_vm1 }
 0x356   : > { %v792_v15 = vmul.f32 %v1317_v13, %v791_v14 }
 0x358   : > { %v793_v17 = vmul.f32 0.5, %v792_v15 }
 0x35a   : > { %v794_v19 = vsub.f32 1.5, %v793_v17 }
 0x35c   : > { %v795_v22 = vmul.f32 %v1317_v13, %v794_v19 }
 0x35e   : > { %v799_v23 = vsel %vm798_vm4, %v1317_v13, %v795_v22 }
 0x35f   : > { %v800_v24 = vmul.f32 %v799_v23, %v787_v20 }
 0x361   : > { %v801_v26 = vmul.f32 %v800_v24, %v783_v60  ;;  %v803_v27 = vperm.slane %v800_v24, 0  ;;  %v900_v60 = vld [vmem:[#allocation5 + $0x2c8] sm:$0xff] }
 0x363   : > { %v802_v28 = vsub.f32 %v788_v25, %v801_v26  ;;  %v807_v29 = vmul.f32 %v803_v27, %v1720_v1  ;;  %v804_v31 = vmul.f32 %v803_v27, %v1707_v52  ;;  %v806_v32 = vmul.f32 %v803_v27, %v1709_v53  ;;  %v873_v52 = vld [vmem:[#allocation5 + $0x1f0] sm:$0xff]  ;;  %v872_v53 = vld [vmem:[#allocation5 + $0x1e8] sm:$0xff]  ;;  %v871_v1 = vld [vmem:[#allocation5 + $0x1e0] sm:$0xff] }
 0x364   : > { %v805_v37 = vmul.f32 %v803_v27, %v1705_v51  ;;  %v874_v51 = vld [vmem:[#allocation5 + $0x1f8] sm:$0xff] }
 0x365   : > { %v808_v30 = vperm.slane %v802_v28, 0  ;;  %907 = vmatpush.msrb.mxu2 %v874_v51 }
 0x367   : > { %v812_v34 = vadd.f32 %v808_v30, %v807_v29  ;;  %v809_v35 = vadd.f32 %v808_v30, %v804_v31  ;;  %v811_v36 = vadd.f32 %v808_v30, %v806_v32  ;;  %v810_v40 = vadd.f32 %v808_v30, %v805_v37  ;;  %908 = vmatpush.msrb.mxu2 %v873_v52 }
 0x369   : > { %v816_v38 = vmax.f32 %v812_v34, 0.0  ;;  %v813_v39 = vmax.f32 %v809_v35, 0.0  ;;  %v815_v41 = vmax.f32 %v811_v36, 0.0  ;;  %v814_v42 = vmax.f32 %v810_v40, 0.0  ;;  %909 = vmatpush.msrb.mxu2 %v872_v53 }
 0x36b   : > { %829 = vmatpush.msrb.mxu1 %v816_v38  ;;  %952 = vmatmul.f32.vlgmr.msrb.gmra.mxu3 %v813_v39 }
 0x36c   : > { %910 = vmatpush.msrb.mxu2 %v871_v1 }
 0x36d   : > { %830 = vmatpush.msrb.mxu1 %v815_v41 }
 0x36e   : > { %911 = vmatpush.msrb.mxu2 %v870_v44 }
 0x36f   : > { %831 = vmatpush.msrb.mxu1 %v814_v42 }
 0x371   : > { %832 = vmatpush.msrb.mxu1 %v813_v39 }
 0x372   : > { %1226 = vmatmul.msk.f32.vlgmr.msrb.gmra.mxu1 %vm536_vm3, %v1648_v11  ;;  %v905_v11 = vld [vmem:[#allocation5 + $0x2f0] sm:$0xff] }
 0x373   : > { %955 = vmatmul.f32.gmra.mxu3 %v814_v42  ;;  %966 = vmatpush.msrb.mxu0 %v905_v11 }
 0x375   : > { %967 = vmatpush.msrb.mxu0 %v904_v55 }
 0x377   : > { %968 = vmatpush.msrb.mxu0 %v903_v56 }
 0x379   : > { %969 = vmatpush.msrb.mxu0 %v902_v57 }
 0x37a   : > { %1227 = vmatmul.msk.f32.gmra.mxu1 %vm536_vm3, %v1656_v16  ;;  %v869_v16 = vld [vmem:[#allocation5 + $0x1d0] sm:$0xff] }
 0x37b   : > { %958 = vmatmul.f32.gmra.mxu3 %v815_v41  ;;  %912 = vmatpush.msrb.mxu2 %v869_v16 }
 0x37c   : > { %970 = vmatpush.msrb.mxu0 %v901_v59 }
 0x37e   : > { %971 = vmatpush.msrb.mxu0 %v900_v60 }
 0x382   : > { %1228 = vmatmul.msk.f32.gmra.mxu1 %vm536_vm3, %v1663_v18  ;;  %v868_v18 = vld [vmem:[#allocation5 + $0x1c8] sm:$0xff] }
 0x383   : > { %961 = vmatmul.f32.gmra.mxu3 %v816_v38  ;;  %913 = vmatpush.msrb.mxu2 %v868_v18 }
 0x38a   : > { %1229 = vmatmul.msk.f32.gmra.mxu1 %vm536_vm3, %v1670_v21  ;;  %v867_v21 = vld [vmem:[#allocation5 + $0x1c0] sm:$0xff] }
 0x38b   : > { %914 = vmatpush.msrb.mxu2 %v867_v21 }
 0x38d   : > { %915 = vmatpush.msrb.mxu2 %v866_v46 }
 0x38f   : > { %916 = vmatpush.msrb.mxu2 %v865_v47 }
 0x391   : > { %917 = vmatpush.msrb.mxu2 %v864_v48 }
 0x392   : > { %1230 = vmatmul.msk.f32.gmra.mxu1 %vm536_vm3, %v1677_v33  ;;  %v861_v33 = vld [vmem:[#allocation5 + $0x190] sm:$0xff] }
 0x393   : > { %918 = vmatpush.msrb.mxu2 %v863_v49 }
 0x395   : > { %919 = vmatpush.msrb.mxu2 %v862_v50 }
 0x397   : > { %920 = vmatpush.msrb.mxu2 %v861_v33 }
 0x399   : > { %921 = vmatpush.msrb.mxu2 %v860_v54 }
 0x39a   : > { %1231 = vmatmul.msk.f32.gmra.mxu1 %vm536_vm3, %v1685_v45  ;;  %v859_v45 = vld [vmem:[#allocation5 + $0x180] sm:$0xff] }
 0x39b   : > { %922 = vmatpush.msrb.mxu2 %v859_v45 }
 0x3a2   : > { %1232 = vmatmul.msk.f32.gmra.mxu1 %vm536_vm3, %v1691_v58  ;;  %v899_v58 = vld [vmem:[#allocation5 + $0x2c0] sm:$0xff] }
 0x3a3   : > { %972 = vmatpush.msrb.mxu0 %v899_v58 }
 0x3a5   : > { %973 = vmatpush.msrb.mxu0 %v898_v61 }
 0x3a7   : > { %974 = vmatpush.msrb.mxu0 %v897_v62 }
 0x3a9   : > { %975 = vmatpush.msrb.mxu0 %v896_v63 }
 0x3aa   : > { %1233 = vmatmul.msk.f32.gmra.mxu1 %vm536_vm3, %v1697_v4  ;;  %v895_v4 = vld [vmem:[#allocation5 + $0x2a0] sm:$0xff] }
 0x3ab   : > { %976 = vmatpush.msrb.mxu0 %v895_v4 }
 0x3ad   : > { %977 = vmatpush.msrb.mxu0 %v894_v0 }
 0x3af   : > { %978 = vmatpush.msrb.mxu0 %v893_v3 }
 0x3b1   : > { %979 = vmatpush.msrb.mxu0 %v892_v2 }
 0x3b3   : > { %980 = vmatpush.msrb.mxu0 %v891_v12 }
 0x3ee   : > { %v953_v23 = vpop.f32.mrf.mxu3 }
 0x3ef   : > { %v834_v8 = vpop.f32.mrf.mxu1 }
 0x3f0   : > { %923 = vmatmul.f32.vlgmr.msrb.gmra.mxu2 %v834_v8 }
 0x3f6   : > { %v956_v26 = vpop.f32.mrf.mxu3 }
 0x3f7   : > { %v837_v10 = vpop.f32.mrf.mxu1 }
 0x3f8   : > { %926 = vmatmul.f32.gmra.mxu2 %v837_v10 }
 0x3fe   : > { %v959_v29 = vpop.f32.mrf.mxu3 }
 0x3ff   : > { %v840_v13 = vpop.f32.mrf.mxu1 }
 0x400   : > { %929 = vmatmul.f32.gmra.mxu2 %v840_v13 }
 0x406   : > { %v962_v40 = vpop.f32.mrf.mxu3 }
 0x407   : > { %v843_v14 = vpop.f32.mrf.mxu1 }
 0x408   : > { %932 = vmatmul.f32.gmra.mxu2 %v843_v14 }
 0x40f   : > { %v846_v15 = vpop.f32.mrf.mxu1 }
 0x410   : > { %981 = vmatmul.f32.vlgmr.msrb.gmra.mxu0 %v846_v15 }
 0x417   : > { %v849_v17 = vpop.f32.mrf.mxu1 }
 0x418   : > { %984 = vmatmul.f32.gmra.mxu0 %v849_v17 }
 0x41f   : > { %v852_v19 = vpop.f32.mrf.mxu1 }
 0x420   : > { %987 = vmatmul.f32.gmra.mxu0 %v852_v19 }
 0x427   : > { %v855_v20 = vpop.f32.mrf.mxu1 }
 0x428   : > { %990 = vmatmul.f32.gmra.mxu0 %v855_v20 }
 0x473   : > { %v924_v22 = vpop.f32.mrf.mxu2 }
 0x474   : > { %v954_v32 = vadd.f32 %v953_v23, %v924_v22 }
 0x47b   : > { %v927_v24 = vpop.f32.mrf.mxu2 }
 0x47c   : > { %v957_v30 = vadd.f32 %v956_v26, %v927_v24 }
 0x483   : > { %v930_v28 = vpop.f32.mrf.mxu2 }
 0x484   : > { %v960_v34 = vadd.f32 %v959_v29, %v930_v28 }
 0x48b   : > { %v933_v38 = vpop.f32.mrf.mxu2 }
 0x48c   : > { %v963_v41 = vadd.f32 %v962_v40, %v933_v38  ;;  %v1045_v38 = vld [vmem:[#allocation7 + $0x3] sm:$0x1] }
 0x48d   : > { %v982_v25 = vpop.f32.mrf.mxu0 }
 0x48e   : > { %v1755_v36 = vadd.f32 %v982_v25, %v954_v32 }
 0x490   : > { %v1015_v42 = vmul.f32 %v1755_v36, %v1755_v36 }
 0x495   : > { %v985_v27 = vpop.f32.mrf.mxu0 }
 0x496   : > { %v1753_v35 = vadd.f32 %v985_v27, %v957_v30  ;;  %v1044_v30 = vld [vmem:[#allocation7 + $0x2] sm:$0x1] }
 0x498   : > { %v1016_v39 = vmul.f32 %v1753_v35, %v1753_v35  ;;  %v994_v51 = vadd.f32 %v1753_v35, %v1755_v36 }
 0x49a   : > { %v1019_v1 = vadd.f32 %v1016_v39, %v1015_v42 }
 0x49d   : > { %v988_v31 = vpop.f32.mrf.mxu0 }
 0x49e   : > { %v1757_v37 = vadd.f32 %v988_v31, %v960_v34 }
 0x4a0   : > { %v1017_v52 = vmul.f32 %v1757_v37, %v1757_v37  ;;  %v995_v43 = vadd.f32 %v994_v51, %v1757_v37 }
 0x4a2   : > { %v1020_v44 = vadd.f32 %v1019_v1, %v1017_v52 }
 0x4a5   : > { %v991_v53 = vpop.f32.mrf.mxu0 }
 0x4a6   : > { %v1768_v11 = vadd.f32 %v991_v53, %v963_v41 }
 0x4a8   : > { %v996_v16 = vadd.f32 %v995_v43, %v1768_v11  ;;  %v1018_v18 = vmul.f32 %v1768_v11, %v1768_v11 }
 0x4aa   : > { %v997_v21 = vrot.slane %v996_v16, 4  ;;  %v1021_v46 = vadd.f32 %v1020_v44, %v1018_v18 }
 0x4ac   : > { %v998_v47 = vadd.f32 %v997_v21, %v996_v16  ;;  %v1022_v48 = vrot.slane %v1021_v46, 4 }
 0x4ae   : > { %v999_v49 = vrot.slane %v998_v47, 2  ;;  %v1023_v50 = vadd.f32 %v1022_v48, %v1021_v46 }
 0x4b0   : > { %v1000_v33 = vadd.f32 %v999_v49, %v998_v47  ;;  %v1024_v54 = vrot.slane %v1023_v50, 2 }
 0x4b2   : > { %v1001_v45 = vrot.slane %v1000_v33, 1  ;;  %v1025_v55 = vadd.f32 %v1024_v54, %v1023_v50 }
 0x4b4   : > { %v1002_v56 = vadd.f32 %v1001_v45, %v1000_v33  ;;  %v1026_v57 = vrot.slane %v1025_v55, 1 }
 0x4b6   : > { %1003 = vrot.lane.b32.xlu2 %v1002_v56, %s1487_s18  ;;  %v1027_v59 = vadd.f32 %v1026_v57, %v1025_v55 }
 0x4b8   : > { %1028 = vrot.lane.b32.xlu0 %v1027_v59, %s1487_s18 }
 0x510   : > { %v1004_v60 = vpop.permute.xlu2 %1003 }
 0x511   : > { %v1005_v58 = vadd.f32 %v1004_v60, %v1002_v56 }
 0x513   : > { %1006 = vrot.lane.b32.xlu1 %v1005_v58, %s1488_s23 }
 0x52a   : > { %v1029_v61 = vpop.permute.xlu0 %1028 }
 0x52b   : > { %v1030_v62 = vadd.f32 %v1029_v61, %v1027_v59 }
 0x52d   : > { %1031 = vrot.lane.b32.xlu2 %v1030_v62, %s1488_s23 }
 0x585   : > { %v1007_v63 = vpop.permute.xlu1 %1006 }
 0x586   : > { %v1008_v4 = vadd.f32 %v1007_v63, %v1005_v58 }
 0x587   : > { %v1032_v0 = vpop.permute.xlu2 %1031 }
 0x588   : > { %v1033_v3 = vadd.f32 %v1032_v0, %v1030_v62  ;;  %1009 = vrot.lane.b32.xlu0 %v1008_v4, %s1489_s29 }
 0x58a   : > { %1034 = vrot.lane.b32.xlu1 %v1033_v3, %s1489_s29 }
 0x5fa   : > { %v1010_v2 = vpop.permute.xlu0 %1009 }
 0x5fb   : > { %v1011_v8 = vadd.f32 %v1010_v2, %v1008_v4 }
 0x5fc   : > { %v1035_v12 = vpop.permute.xlu1 %1034 }
 0x5fd   : > { %v1036_v10 = vadd.f32 %v1035_v12, %v1033_v3  ;;  %1012 = vrot.lane.b32.xlu2 %v1011_v8, %s1490_s30 }
 0x5ff   : > { %1037 = vrot.lane.b32.xlu0 %v1036_v10, %s1490_s30 }
 0x657   : > { %v1013_v13 = vpop.permute.xlu2 %1012 }
 0x658   : > { %v1014_v14 = vadd.f32 %v1013_v13, %v1011_v8 }
 0x65a   : > { %v1040_v15 = vmul.f32 0.001953125, %v1014_v14 }
 0x65c   : > { %v1042_v20 = vmul.f32 %v1040_v15, %v1040_v15 }
 0x671   : > { %v1038_v17 = vpop.permute.xlu0 %1037 }
 0x672   : > { %v1039_v19 = vadd.f32 %v1038_v17, %v1036_v10 }
 0x674   : > { %v1041_v22 = vmul.f32 0.001953125, %v1039_v19 }
 0x676   : > { %v1043_v23 = vsub.f32 %v1041_v22, %v1042_v20 }
 0x678   : > { %v1046_v24 = vadd.f32 1e-05, %v1043_v23 }
 0x67a   : > { %1318 = vrsqrt.f32 %v1046_v24  ;;  %vm1053_vm5 = vweird.f32 %v1046_v24 }
 0x680   : > { %v1319_v25 = vpop.eup %1318 }
 0x681   : > { %v1048_v26 = vmul.f32 %v1319_v25, %v1046_v24  ;;  %vm1054_vm3 = vweird.f32 %v1319_v25 }
 0x682   : > { %vm1055_vm6 = vmor %vm1053_vm5, %vm1054_vm3 }
 0x683   : > { %v1049_v27 = vmul.f32 %v1319_v25, %v1048_v26 }
 0x685   : > { %v1050_v28 = vmul.f32 0.5, %v1049_v27 }
 0x687   : > { %v1051_v29 = vsub.f32 1.5, %v1050_v28 }
 0x689   : > { %v1052_v31 = vmul.f32 %v1319_v25, %v1051_v29 }
 0x68b   : > { %v1056_v32 = vsel %vm1055_vm6, %v1319_v25, %v1052_v31 }
 0x68c   : > { %v1057_v34 = vmul.f32 %v1056_v32, %v1044_v30 }
 0x68e   : > { %v1058_v39 = vmul.f32 %v1057_v34, %v1040_v15  ;;  %v1060_v40 = vperm.slane %v1057_v34, 0 }
 0x690   : > { %v1059_v41 = vsub.f32 %v1045_v38, %v1058_v39  ;;  %v1061_v42 = vmul.f32 %v1060_v40, %v1755_v36  ;;  %v1062_v51 = vmul.f32 %v1060_v40, %v1753_v35  ;;  %v1063_v52 = vmul.f32 %v1060_v40, %v1757_v37 }
 0x691   : > { %v1064_v53 = vmul.f32 %v1060_v40, %v1768_v11 }
 0x692   : > { %v1065_v1 = vperm.slane %v1059_v41, 0 }
 0x694   : > { %v1066_v43 = vadd.f32 %v1065_v1, %v1061_v42  ;;  %v1067_v44 = vadd.f32 %v1065_v1, %v1062_v51  ;;  %v1068_v16 = vadd.f32 %v1065_v1, %v1063_v52  ;;  %v1069_v18 = vadd.f32 %v1065_v1, %v1064_v53 }
 0x696   : > { %v1070_v21 = vadd.f32 %v1066_v43, %v1644_v9  ;;  %v1071_v36 = vadd.f32 %v1067_v44, %v1640_v7  ;;  %v1072_v35 = vadd.f32 %v1068_v16, %v1637_v6  ;;  %v1073_v37 = vadd.f32 %v1069_v18, %v1635_v5 }
 0x698   : > { %v1074_v11 = vmax.f32 %v1070_v21, 0.0  ;;  %v1075_v46 = vmax.f32 %v1071_v36, 0.0  ;;  %v1076_v47 = vmax.f32 %v1072_v35, 0.0  ;;  %v1077_v48 = vmax.f32 %v1073_v37, 0.0 }
 0x69a   : > { %1078 = vst [vmem:[%s221_s7] sm:$0xff] %v1074_v11 }
 0x69b   : > { %1079 = vst [vmem:[%s221_s7 + $0x8] sm:$0xff] %v1075_v46 }
 0x69c   : > { %1080 = vst [vmem:[%s221_s7 + $0x10] sm:$0xff] %v1076_v47 }
 0x69d   : > { %1081 = vst [vmem:[%s221_s7 + $0x18] sm:$0xff] %v1077_v48 }
 0x69e   : > { %1437 = shalt.err (!%p1434_p10)
}
 0x69f   : > { %s1491_s11 = smov 128  }
 0x6a0   : > { %1251 = dma.vmem_to_hbm [thread:$0]  (%p1581_p3), %s1096_s16, 512, %s1098_s8, %s1083_s17, %s1491_s11, %s1491_s11, %s1487_s18  }
 0x6a1 PF: > { %s1112_s29 = sand.u32 1, %s1468_s12   ;;  %p1834_p12 = scmp.ge.s32.totalorder %s1480_s15, 2 }
 0x6a2   : > { %s1113_s30 = scalar_lea.sflag [#allocation4], %s1112_s29 }
 0x6a3   : > { %p1265_p13 = pnand %p1834_p12, %p1547_p6 }
 0x6a5   : > { %p1266_p0 = pneg %p1265_p13 }
 0x6a7   : > { %1463 = dma.done.wait (%p1266_p0), %s1113_s30, 512  }
 0x6a8   : > { %1465 = vsyncadd (%p1266_p0), %s1113_s30, 4294966784  ;;  %p17_p5 = scmp.ge.s32.totalorder %s1571_s6, 4   ;;  %s1835_s12 = smov %s1472_s13 }
 0x6a9   : > { %s1836_s13 = smov %s1476_s14  ;;  %s1837_s14 = smov %s1587_s10 }
 0x6aa   : > { %s1838_s15 = smov %s1571_s6  ;;  %19 = sbr.rel (!%p17_p5) target bundleno = 6 (0x6), region = 86 }
 0x6af   :  { %1119 = vsyncpa [#allocation3], 1 }
 0x6b0   :  { %1121 = vsyncpa [#allocation3 + $0x1], 1 }
 0x6b1   :  { %1122 = vsyncpa [#allocation6], 1 }
 0x6b2   :  { %1123 = vsyncpa [#allocation4], 1 }
 0x6b3   :  { %1125 = vsyncpa [#allocation4 + $0x1], 1 }

</bundles_post_ra>
